<compile_context>
chip_gen: v7x
topology: tpu7x:2x2x1
jax: 0.10.0
libtpu: 0.0.40
codegen_flags: <defaults>
</compile_context>

<pallas_src>
import jax
import jax.numpy as jnp
from jax.experimental import pallas as pl
from jax.experimental.pallas import tpu as pltpu

LANE = 128
_MIB = 1024 * 1024


def _h_swish_kernel(x_ref, o_ref):
    # Compute in f32 regardless of input dtype (free: kernel is HBM-bound).
    x = x_ref[...].astype(jnp.float32)
    hs = jnp.minimum(jnp.maximum(x + 3.0, 0.0), 6.0) * (1.0 / 6.0)
    o_ref[...] = (x * hs).astype(o_ref.dtype)


def _h_swish_jnp(x):
    xf = x.astype(jnp.float32)
    return (xf * (jnp.clip(xf + 3.0, 0.0, 6.0) * (1.0 / 6.0))).astype(x.dtype)


def _gen_params():
    """Per-generation (block byte budget, vmem_limit_bytes or None)."""
    kind = ""
    try:
        kind = jax.devices()[0].device_kind.lower()
    except Exception:
        pass
    if "v7" in kind or "7x" in kind:
        # v7x: ~3.2 TB/s HBM -> 8 MiB blocks; 2 arrays x 2 bufs x 8 MiB = 32 MiB,
        # raise scoped VMEM above the 32 MiB default but stay under 64 MiB phys.
        return 8 * _MIB, 48 * _MIB
    if "v6" in kind:
        # v6e: 4 MiB blocks -> 16 MiB double-buffered, under the 32 MiB default.
        return 4 * _MIB, None
    # v5e (16 MiB scoped default) and anything unknown: conservative 2 MiB.
    return 2 * _MIB, None


def _sublane(dtype) -> int:
    """Packed sublane tile height: 8 for 32-bit, 16 for bf16/f16, 32 for int8."""
    itemsize = jnp.dtype(dtype).itemsize
    return 8 * max(1, 4 // max(1, itemsize))


def _pick_width(n_elem: int) -> int:
    """Widest lane-dense last dim (multiple of 128) that divides n_elem."""
    for cand in (4096, 2048, 1024, 512, 256, 128):
        if n_elem % cand == 0:
            return cand
    return 0


def _pick_tile_rows(rows, width, itemsize, block_bytes, sub):
    if rows <= sub:
        return rows  # full-extent second-to-last dim (always legal)
    max_rows = max(sub, (block_bytes // (width * itemsize)) // sub * sub)
    best, best_key = sub, (False, False, False, 0)
    for tr in range(sub, min(max_rows, rows) + 1, sub):
        g = -(-rows // tr)
        key = (
            g >= 2,           # megacore: both v7x TensorCores get work
            rows % tr == 0,   # exact division -> no masked vst on last block
            g % 2 == 0,       # even grid -> balanced split across 2 TCs
            tr,               # biggest block -> least per-step overhead
        )
        if key > best_key:
            best, best_key = tr, key
    return best


def _run_2d(x2d, block_bytes, vmem_limit):
    rows, width = x2d.shape
    dtype = x2d.dtype
    itemsize = jnp.dtype(dtype).itemsize
    sub = _sublane(dtype)
    tile_rows = _pick_tile_rows(rows, width, itemsize, block_bytes, sub)
    grid = (pl.cdiv(rows, tile_rows),)
    n = rows * width
    return pl.pallas_call(
        _h_swish_kernel,
        out_shape=jax.ShapeDtypeStruct((rows, width), dtype),
        grid=grid,
        in_specs=[pl.BlockSpec((tile_rows, width), lambda i: (i, 0))],
        out_specs=pl.BlockSpec((tile_rows, width), lambda i: (i, 0)),
        compiler_params=pltpu.CompilerParams(
            dimension_semantics=("parallel",),
            vmem_limit_bytes=vmem_limit,
        ),
        cost_estimate=pl.CostEstimate(
            flops=5 * n,              # add, max, min, mul(1/6), mul(x)
            transcendentals=0,
            bytes_accessed=2 * n * itemsize,
        ),
    )(x2d)


def h_swish(x: jax.Array) -> jax.Array:
    """Elementwise h_swish, semantics identical to torch: x * relu6(x+3)/6."""
    orig_shape = x.shape
    n = x.size
    if n == 0:
        return x
    block_bytes, vmem_limit = _gen_params()

    width = _pick_width(n)
    if width:
        # Common path (all conv-style NCHW shapes): zero-copy lane-dense slab.
        x2d = jnp.ravel(x).reshape(n // width, width)
        return _run_2d(x2d, block_bytes, vmem_limit).reshape(orig_shape)

    # Rare path: n not a multiple of 128.  Kernel on the aligned bulk, tiny
    # (<128-elem) tail with plain fused jnp; no full-array pad + slice copies.
    bulk = (n // LANE) * LANE
    if bulk == 0:
        return _h_swish_jnp(x)
    x_flat = jnp.ravel(x)
    head = _run_2d(x_flat[:bulk].reshape(bulk // LANE, LANE), block_bytes, vmem_limit)
    tail = _h_swish_jnp(x_flat[bulk:])
    return jnp.concatenate([head.reshape(-1), tail]).reshape(orig_shape)


def _ref(x):
    xf = x.astype(jnp.float32)
    return (xf * (jnp.clip(xf + 3.0, 0.0, 6.0) / 6.0)).astype(x.dtype)


if __name__ == "__main__":
    key = jax.random.PRNGKey(0)
    k1, k2, k3, k4, k5 = jax.random.split(key, 5)

    # 1) NCHW input matching the PyTorch spec layout.
    x = jax.random.normal(k1, (2, 4, 16, 16), dtype=jnp.float32) * 4.0
    y = h_swish(x)
    jax.block_until_ready(y)
    assert y.shape == x.shape and y.dtype == x.dtype
    assert jnp.allclose(y, _ref(x), atol=1e-6, rtol=1e-6)

    # 2) Multi-step, even, exactly-dividing parallel grid.
    x2 = jax.random.normal(k2, (2, 8, 64, 64), dtype=jnp.float32) * 4.0
    y2 = h_swish(x2)
    jax.block_until_ready(y2)
    assert jnp.allclose(y2, _ref(x2), atol=1e-6, rtol=1e-6)

    # 3) bf16 input (dtype-aware sublane path; math done in f32 in-kernel).
    x3 = (jax.random.normal(k3, (4, 8, 32, 32), dtype=jnp.float32) * 4.0).astype(jnp.bfloat16)
    y3 = h_swish(x3)
    jax.block_until_ready(y3)
    assert y3.dtype == jnp.bfloat16
    assert jnp.allclose(y3.astype(jnp.float32), _ref(x3).astype(jnp.float32),
                        atol=5e-2, rtol=5e-2)

    # 4) Non-dividing last grid block (masked-store path): 17 rows, tile 16.
    x4 = jax.random.normal(k4, (17, 128), dtype=jnp.float32) * 4.0
    y4 = h_swish(x4)
    jax.block_until_ready(y4)
    assert jnp.allclose(y4, _ref(x4), atol=1e-6, rtol=1e-6)

    # 5) Non-%128 element count: bulk kernel + jnp tail path.
    x5 = jax.random.normal(k5, (3, 5, 67), dtype=jnp.float32) * 4.0
    y5 = h_swish(x5)
    jax.block_until_ready(y5)
    assert y5.shape == x5.shape
    assert jnp.allclose(y5, _ref(x5), atol=1e-6, rtol=1e-6)

    print("KERNEL_OK")
</pallas_src>

<mosaic_0001>
module attributes {stable_mosaic.version = 11 : i64} {
  func.func @_h_swish_kernel(%arg0: i32, %arg1: memref<1x2048xf32, #tpu.memory_space<vmem>>, %arg2: memref<1x2048xf32, #tpu.memory_space<vmem>>) attributes {dimension_semantics = [#tpu.dimension_semantics<parallel>], iteration_bounds = array<i64: 1>, scalar_prefetch = 0 : i64, scratch_operands = 0 : i64, tpu.core_type = #tpu.core_type<tc>, window_params = [{transform_indices = @transform_0, window_bounds = array<i64: 1, 2048>}, {transform_indices = @transform_1, window_bounds = array<i64: 1, 2048>}]} {
    %c0 = arith.constant 0 : index
    %c0_0 = arith.constant 0 : index
    %0 = vector.load %arg1[%c0, %c0_0] : memref<1x2048xf32, #tpu.memory_space<vmem>>, vector<1x2048xf32>
    %cst = arith.constant 3.000000e+00 : f32
    %1 = vector.broadcast %cst : f32 to vector<1x2048xf32>
    %2 = arith.addf %0, %1 : vector<1x2048xf32>
    %cst_1 = arith.constant 0.000000e+00 : f32
    %3 = vector.broadcast %cst_1 : f32 to vector<1x2048xf32>
    %4 = arith.maximumf %2, %3 : vector<1x2048xf32>
    %cst_2 = arith.constant 6.000000e+00 : f32
    %5 = vector.broadcast %cst_2 : f32 to vector<1x2048xf32>
    %6 = arith.minimumf %4, %5 : vector<1x2048xf32>
    %cst_3 = arith.constant 0.166666672 : f32
    %7 = vector.broadcast %cst_3 : f32 to vector<1x2048xf32>
    %8 = arith.mulf %6, %7 : vector<1x2048xf32>
    %9 = arith.mulf %0, %8 : vector<1x2048xf32>
    %c0_4 = arith.constant 0 : index
    %c0_5 = arith.constant 0 : index
    %10 = vector.load %arg2[%c0_4, %c0_5] : memref<1x2048xf32, #tpu.memory_space<vmem>>, vector<1x2048xf32>
    tpu.vector_store %arg2[%c0_4, %c0_5], %9 {strides = array<i32>} : memref<1x2048xf32, #tpu.memory_space<vmem>>, vector<1x2048xf32>,
    return
  }
  func.func @transform_0(%arg0: i32) -> (i32, i32) {
    %c0_i32 = arith.constant 0 : i32
    %c0_i32_0 = arith.constant 0 : i32
    return %arg0, %c0_i32 : i32, i32
  }
  func.func @transform_1(%arg0: i32) -> (i32, i32) {
    %c0_i32 = arith.constant 0 : i32
    %c0_i32_0 = arith.constant 0 : i32
    return %arg0, %c0_i32 : i32, i32
  }
}

</mosaic_0001>

<bundles_post_ra>
// kernel: tpu_custom_call.1
= control target key start
LH: loop header
LB: loop body
LE: loop exit
PB: predicated region body
PF: predicated region fallthrough
CT: control target
= control target key end

     0   :  { %6 = vsyncpa [#allocation3], 0  ;;  %s136_s0 = inlined_call_operand.hbm [shape: f32[1,2048], index: 0, kind: input, shape index: {}]   ;;  %s137_s1 = inlined_call_operand.hbm [shape: f32[1,2048], index: 1, kind: output, shape index: {}]  }
   0x1   :  { %7 = vsyncpa [#allocation4], 0  ;;  %s100_s6 = smov [#allocation2]   ;;  %s52_s10 = scalar_lea.hbm %s136_s0, 256 }
   0x2   :  { %s14_s7 = sshll.u32 %s100_s6, 4  ;;  %p53_p0 = scmp.ne.s32.totalorder %s136_s0, %s52_s10  ;;  %s15_s7 = int_to_ptr.vmem [resolvable:$true] %s14_s7 }
   0x3   :  { %p56_p1 = scmp.lt.u32.totalorder %s52_s10, %s136_s0 }
   0x5   :  { %p58_p2 = pnand %p56_p1, %p53_p0 }
   0x7   :  { %61 = shalt.err (!%p58_p2)
}
   0x8   :  { %s62_s15 = scalar_lea.vmem %s15_s7, 256  ;;  %p67_p4 = scmp.lt.s32.totalorder %s15_s7, %s15_s7 }
   0x9   :  { %p63_p3 = scmp.ne.s32.totalorder %s15_s7, %s62_s15  ;;  %p68_p5 = scmp.lt.s32.totalorder %s62_s15, %s62_s15 }
   0xb   :  { %p69_p6 = por %p68_p5, %p67_p4 }
   0xd   :  { %p70_p7 = pnand %p69_p6, %p63_p3 }
   0xf   :  { %73 = shalt.err (!%p70_p7)
}
  0x10   :  { %17 = dma.hbm_to_vmem [thread:$0]  %s136_s0, 256, %s15_s7, [#allocation3]  }
  0x11   :  { %96 = dma.done.wait [#allocation3], 256  }
  0x12   :  { %97 = vsyncadd [#allocation3], 4294967040  ;;  %v21_v0 = vld [vmem:[#allocation2] sm:$0xff]  ;;  %v22_v1 = vld [vmem:[#allocation2 + $0x8] sm:$0xff]  ;;  %s101_s18 = smov [#allocation5]  }
  0x13   :  { %v23_v2 = vadd.f32 3.0, %v21_v0  ;;  %v24_v3 = vadd.f32 3.0, %v22_v1  ;;  %s41_s19 = sshll.u32 %s101_s18, 4  ;;  %s42_s19 = int_to_ptr.vmem [resolvable:$true] %s41_s19 }
  0x14   :  { %s74_s0 = scalar_lea.vmem %s42_s19, 256  ;;  %p79_p9 = scmp.lt.s32.totalorder %s42_s19, %s42_s19 }
  0x15   :  { %v25_v4 = vmax.f32 %v23_v2, 0.0  ;;  %v26_v5 = vmax.f32 %v24_v3, 0.0  ;;  %p75_p8 = scmp.ne.s32.totalorder %s42_s19, %s74_s0  ;;  %p80_p10 = scmp.lt.s32.totalorder %s74_s0, %s74_s0 }
  0x17   :  { %v27_v6 = vmin.f32 %v25_v4, 6.0  ;;  %v28_v7 = vmin.f32 %v26_v5, 6.0  ;;  %p81_p11 = por %p80_p10, %p79_p9 }
  0x19   :  { %v29_v8 = vmul.f32 0.16666667, %v27_v6  ;;  %v30_v9 = vmul.f32 0.16666667, %v28_v7  ;;  %p82_p12 = pnand %p81_p11, %p75_p8 }
  0x1b   :  { %v31_v10 = vmul.f32 %v29_v8, %v21_v0  ;;  %v32_v11 = vmul.f32 %v30_v9, %v22_v1 }
  0x1d   :  { %33 = vst [vmem:[#allocation5] sm:$0xff] %v31_v10  ;;  %34 = vst [vmem:[#allocation5 + $0x8] sm:$0xff] %v32_v11 }
  0x1e   :  { %85 = shalt.err (!%p82_p12)
}
  0x1f   :  { %s86_s22 = scalar_lea.hbm %s137_s1, 256 }
  0x20   :  { %p87_p13 = scmp.ne.s32.totalorder %s137_s1, %s86_s22  ;;  %p90_p0 = scmp.lt.u32.totalorder %s86_s22, %s137_s1 }
  0x22   :  { %p92_p1 = pnand %p90_p0, %p87_p13 }
  0x24   :  { %95 = shalt.err (!%p92_p1)
}
  0x25   :  { %44 = dma.vmem_to_hbm [thread:$0]  %s42_s19, 256, %s137_s1, [#allocation4]  }
  0x26   :  { %98 = dma.done.wait [#allocation4], 256  }
  0x27   :  { %99 = vsyncadd [#allocation4], 4294967040 }
  0x28   :  { %48 = vsyncpa [#allocation3], 1 }
  0x29   :  { %49 = vsyncpa [#allocation4], 1 }

</bundles_post_ra>
